<compile_context>
chip_gen: v7x
topology: tpu7x:2x2x1
jax: 0.10.0
libtpu: 0.0.40
codegen_flags: <defaults>
</compile_context>

<pallas_src>
import math

import jax
import jax.numpy as jnp
from jax import lax
from jax.experimental import pallas as pl
from jax.experimental.pallas import tpu as pltpu

S = 64.0
M = 0.5
COS_M = math.cos(M)
SIN_M = math.sin(M)
SIN_PI_M = math.sin(math.pi - M)
S_SIN_M = S * SIN_M


def _round_up(v, m):
    return -(-v // m) * m


def _round_down(v, m):
    return (v // m) * m


def _choose_column_tile(B, C, N, tile_budget_bytes=24 << 20):
    """Column-tile width for the main kernel.

    Big enough that each grid step moves MBs (amortizes ~0.35us/step overhead),
    small enough that the double-buffered (x in + logits out) f32 tiles fit the
    budget, and capped so the grid keeps >= 2 roughly balanced tiles for v7x
    megacore sharding.
    """
    bytes_per_col = 2 * 4 * (B + N)                  # double-buffered f32 in + out
    tc = max(128, _round_down(tile_budget_bytes // bytes_per_col, 128))
    if C >= 256:
        tc = min(tc, _round_up(_round_up(C, 2) // 2, 128))   # keep >= 2 tiles
    tc = min(tc, _round_up(C, 128))
    return int(tc)


# ---------------------------------------------------------------------------
# Main kernel: one (N, tc) logits column tile per grid step.
# ---------------------------------------------------------------------------
def _arcface_kernel(x_ref, wg_ref, apos_ref, aneg_ref, out_ref):
    # cos[n, c] = sum_b wg_scaled[b, n] * x[b, c]
    # Both row normalizations are folded into wg_scaled (resident, tiny); the
    # streamed x tile goes straight to the MXU. Contraction dim (B) is tiny, so
    # f32 operands cost nothing measurable and keep exact cos>0 branch parity.
    cos = lax.dot_general(wg_ref[...], x_ref[...],
                          (((0,), (0,)), ((), ())),
                          preferred_element_type=jnp.float32)        # (N, tc)
    # Clamped (torch's sqrt(1-cos^2) would NaN if |cos|>1 from rounding) — benign,
    # documented divergence.
    sin = jnp.sqrt(jnp.maximum(1.0 - cos * cos, 0.0))
    out_ref[...] = jnp.where(cos > 0.0,
                             apos_ref[...] - S_SIN_M * sin,
                             aneg_ref[...]).astype(out_ref.dtype)


# ---------------------------------------------------------------------------
# Wrapper
# ---------------------------------------------------------------------------
@jax.jit
def arcface_forward(x, w, fc_w, fc_b, labels):
    """x: (B,C), w: (B,C), fc_w: (1,C), fc_b: (1,), labels: (N,) int -> (N,C) logits."""
    B, C = x.shape
    N = int(labels.shape[0])

    x32 = x.astype(jnp.float32)
    w32 = w.astype(jnp.float32)
    fcw = fc_w.reshape(1, C).astype(jnp.float32)
    fcb = fc_b.reshape(()).astype(jnp.float32)
    lbl = labels.astype(jnp.int32)

    # ---- Hoisted invariants: O(B*C) row reductions + O(B*N) label work, done once
    #      in plain JAX (fused XLA streaming reductions; per perf review this beats a
    #      dedicated Pallas stats pass and runs on all cores).
    inv_x = lax.rsqrt(jnp.maximum(jnp.sum(x32 * x32, axis=1, keepdims=True), 1e-24))   # (B,1)
    inv_w = lax.rsqrt(jnp.maximum(jnp.sum(w32 * w32, axis=1, keepdims=True), 1e-24))   # (B,1)
    row_sum_w = jnp.sum(w32, axis=1, keepdims=True)                                    # (B,1)
    proj = jnp.sum(x32 * fcw, axis=1, keepdims=True) * inv_x        # (B,1) = x_norm @ fc_w.T
    wp = inv_w * proj                                               # (B,1)
    sum_fc = jnp.sum(row_sum_w * wp) + C * fcb                      # scalar = sum_c cos_th_fc[c]

    w_g = jnp.take(w32, lbl, axis=1)                                # (B,N) gathered label columns
    fc_lbl = jnp.sum(w_g * wp, axis=0, keepdims=True).T + fcb       # (N,1) = cos_th_fc[labels]
    wg_scaled = w_g * (inv_w * inv_x)                               # (B,N) both norms folded in

    # Per-row constants of the margin formula (everything except the sin term):
    #   logits[n,c] = where(cos>0, a_pos[n] - S*sin(m)*sin[n,c], a_neg[n])
    a_pos = S * (fc_lbl * COS_M + (sum_fc - fc_lbl))                # (N,1)
    a_neg = S * ((fc_lbl - M * SIN_PI_M) + (sum_fc - fc_lbl))       # (N,1)

    # ---- Pallas: stream x column tiles, write logits column tiles.
    tc = _choose_column_tile(B, C, N)
    num_tiles = pl.cdiv(C, tc)
    # VMEM actually used: double-buffered streamed in/out tiles + small resident inputs
    # (conservatively counted double-buffered too), plus 1.5x headroom for compiler
    # scratch — stays well under v7x's 64 MiB physical VMEM.
    buf_bytes = 2 * 4 * tc * (B + N) + 2 * 4 * (B * N + 2 * N)
    vmem_limit = int(min(56 << 20, max(32 << 20, (buf_bytes * 3) // 2)))

    out = pl.pallas_call(
        _arcface_kernel,
        out_shape=jax.ShapeDtypeStruct((N, C), jnp.float32),
        grid=(num_tiles,),
        in_specs=[
            pl.BlockSpec((B, tc), lambda j: (0, j)),     # streamed x column tile
            pl.BlockSpec((B, N), lambda j: (0, 0)),      # resident gathered+normalized w cols
            pl.BlockSpec((N, 1), lambda j: (0, 0)),      # resident per-row const (cos>0 branch)
            pl.BlockSpec((N, 1), lambda j: (0, 0)),      # resident per-row const (else branch)
        ],
        out_specs=pl.BlockSpec((N, tc), lambda j: (0, j)),
        compiler_params=pltpu.CompilerParams(
            dimension_semantics=("parallel",),           # megacore sharding on v7x
            vmem_limit_bytes=vmem_limit),
    )(x32, wg_scaled, a_pos, a_neg)
    return out


def arcface_ref(x, w, fc_w, fc_b, labels):
    """Faithful f32 port of the PyTorch forward (materializes the full (C,C) cos matrix)."""
    hp = lax.Precision.HIGHEST
    xn = x * lax.rsqrt(jnp.maximum(jnp.sum(x * x, axis=1, keepdims=True), 1e-24))
    wn = w * lax.rsqrt(jnp.maximum(jnp.sum(w * w, axis=1, keepdims=True), 1e-24))
    cos_th = jnp.dot(wn.T, xn, precision=hp)                        # (C, C)
    cos_th_fc = jnp.dot(cos_th, fc_w.T, precision=hp) + fc_b        # (C, 1)
    sin_th = jnp.sqrt(jnp.maximum(1.0 - cos_th ** 2, 0.0))
    cos_th_m = jnp.where(cos_th > 0,
                         cos_th_fc * COS_M - sin_th * SIN_M,
                         cos_th_fc - M * SIN_PI_M)
    one_hot = jax.nn.one_hot(labels, x.shape[1], dtype=jnp.float32)
    logits = (jnp.dot(one_hot, cos_th_m, precision=hp)
              + jnp.dot(1.0 - one_hot, cos_th_fc, precision=hp)) * S
    return logits, cos_th


if __name__ == "__main__":
    # Small shapes consistent with the module: x must be (batch, num_classes) for the
    # in-forward Linear(num_classes, 1) to type-check; labels has batch entries.
    B, C, N = 8, 512, 8
    key = jax.random.PRNGKey(0)
    k1, k2, k3, k4, k5 = jax.random.split(key, 5)

    x = jax.random.normal(k1, (B, C), jnp.float32)
    # Deterministic stand-ins for the module's (uninitialized) Parameter and the
    # fresh nn.Linear created inside forward().
    w = jax.random.normal(k2, (B, C), jnp.float32) * 0.1
    fc_w = jax.random.normal(k3, (1, C), jnp.float32) * (1.0 / math.sqrt(C))
    fc_b = jax.random.normal(k4, (1,), jnp.float32) * 0.01
    labels = jax.random.randint(k5, (N,), 0, C, jnp.int32)

    out = arcface_forward(x, w, fc_w, fc_b, labels)
    jax.block_until_ready(out)
    assert out.shape == (N, C), out.shape
    assert not bool(jnp.any(jnp.isnan(out))), "NaN in kernel output"

    ref, cos_th = arcface_ref(x, w, fc_w, fc_b, labels)
    # The contraction now runs in f32 on both sides; only cosines within float
    # rounding distance of zero can legitimately land on either side of the hard
    # `cos_th > 0` branch, so exclude that tiny sliver from the comparison.
    cos_rows = cos_th[labels, :]                                    # the rows actually consumed
    near_branch = jnp.abs(cos_rows) < 1e-5
    tol = 5e-3 + 5e-4 * jnp.abs(ref)
    ok = (jnp.abs(out - ref) <= tol) | near_branch
    assert float(jnp.mean(near_branch.astype(jnp.float32))) < 0.05, \
        "threshold-ambiguity mask unexpectedly large"
    assert bool(jnp.all(ok)), "mismatch vs JAX reference"
    print("KERNEL_OK")
</pallas_src>

<mosaic_0001>
module attributes {stable_mosaic.version = 11 : i64} {
  func.func @_arcface_kernel(%arg0: i32, %arg1: memref<8x256xf32, #tpu.memory_space<vmem>>, %arg2: memref<8x8xf32, #tpu.memory_space<vmem>>, %arg3: memref<8x1xf32, #tpu.memory_space<vmem>>, %arg4: memref<8x1xf32, #tpu.memory_space<vmem>>, %arg5: memref<8x256xf32, #tpu.memory_space<vmem>>) attributes {dimension_semantics = [#tpu.dimension_semantics<parallel>], iteration_bounds = array<i64: 2>, scalar_prefetch = 0 : i64, scratch_operands = 0 : i64, tpu.core_type = #tpu.core_type<tc>, window_params = [{transform_indices = @transform_0, window_bounds = array<i64: 8, 256>}, {pipeline_mode = #tpu.pipeline_mode<synchronous>, transform_indices = @transform_1, window_bounds = array<i64: 8, 8>}, {pipeline_mode = #tpu.pipeline_mode<synchronous>, transform_indices = @transform_2, window_bounds = array<i64: 8, 1>}, {pipeline_mode = #tpu.pipeline_mode<synchronous>, transform_indices = @transform_3, window_bounds = array<i64: 8, 1>}, {transform_indices = @transform_4, window_bounds = array<i64: 8, 256>}]} {
    %c0 = arith.constant 0 : index
    %c0_0 = arith.constant 0 : index
    %0 = vector.load %arg2[%c0, %c0_0] : memref<8x8xf32, #tpu.memory_space<vmem>>, vector<8x8xf32>
    %c0_1 = arith.constant 0 : index
    %c0_2 = arith.constant 0 : index
    %1 = vector.load %arg1[%c0_1, %c0_2] : memref<8x256xf32, #tpu.memory_space<vmem>>, vector<8x256xf32>
    %cst = arith.constant dense<0.000000e+00> : vector<8x256xf32>
    %2 = tpu.matmul %0, %1, %cst {dimension_numbers = #tpu.dot_dimension_numbers<[0], [0], [1], [1], [0, 1, 1, 1], [], []>} : vector<8x8xf32>, vector<8x256xf32>, vector<8x256xf32> -> vector<8x256xf32>
    %3 = arith.mulf %2, %2 : vector<8x256xf32>
    %cst_3 = arith.constant 1.000000e+00 : f32
    %4 = vector.broadcast %cst_3 : f32 to vector<8x256xf32>
    %5 = arith.subf %4, %3 : vector<8x256xf32>
    %cst_4 = arith.constant 0.000000e+00 : f32
    %6 = vector.broadcast %cst_4 : f32 to vector<8x256xf32>
    %7 = arith.maximumf %5, %6 : vector<8x256xf32>
    %8 = math.sqrt %7 : vector<8x256xf32>
    %cst_5 = arith.constant 0.000000e+00 : f32
    %9 = vector.broadcast %cst_5 : f32 to vector<8x256xf32>
    %10 = arith.cmpf ogt, %2, %9 : vector<8x256xf32>
    %c0_6 = arith.constant 0 : index
    %c0_7 = arith.constant 0 : index
    %11 = vector.load %arg3[%c0_6, %c0_7] : memref<8x1xf32, #tpu.memory_space<vmem>>, vector<8x1xf32>
    %cst_8 = arith.constant 30.6832352 : f32
    %12 = vector.broadcast %cst_8 : f32 to vector<8x256xf32>
    %13 = arith.mulf %12, %8 : vector<8x256xf32>
    %14 = vector.broadcast %11 : vector<8x1xf32> to vector<8x256xf32>
    %15 = arith.subf %14, %13 : vector<8x256xf32>
    %c0_9 = arith.constant 0 : index
    %c0_10 = arith.constant 0 : index
    %16 = vector.load %arg4[%c0_9, %c0_10] : memref<8x1xf32, #tpu.memory_space<vmem>>, vector<8x1xf32>
    %17 = vector.shape_cast %16 : vector<8x1xf32> to vector<8x1xf32>
    %18 = vector.broadcast %17 : vector<8x1xf32> to vector<8x256xf32>
    %19 = arith.select %10, %15, %18 : vector<8x256xi1>, vector<8x256xf32>
    %c0_11 = arith.constant 0 : index
    %c0_12 = arith.constant 0 : index
    %20 = vector.load %arg5[%c0_11, %c0_12] : memref<8x256xf32, #tpu.memory_space<vmem>>, vector<8x256xf32>
    tpu.vector_store %arg5[%c0_11, %c0_12], %19 {strides = array<i32>} : memref<8x256xf32, #tpu.memory_space<vmem>>, vector<8x256xf32>,
    return
  }
  func.func @transform_0(%arg0: i32) -> (i32, i32) {
    %c0_i32 = arith.constant 0 : i32
    %c0_i32_0 = arith.constant 0 : i32
    return %c0_i32, %arg0 : i32, i32
  }
  func.func @transform_1(%arg0: i32) -> (i32, i32) {
    %c0_i32 = arith.constant 0 : i32
    %c0_i32_0 = arith.constant 0 : i32
    %c0_i32_1 = arith.constant 0 : i32
    return %c0_i32, %c0_i32_0 : i32, i32
  }
  func.func @transform_2(%arg0: i32) -> (i32, i32) {
    %c0_i32 = arith.constant 0 : i32
    %c0_i32_0 = arith.constant 0 : i32
    %c0_i32_1 = arith.constant 0 : i32
    return %c0_i32, %c0_i32_0 : i32, i32
  }
  func.func @transform_3(%arg0: i32) -> (i32, i32) {
    %c0_i32 = arith.constant 0 : i32
    %c0_i32_0 = arith.constant 0 : i32
    %c0_i32_1 = arith.constant 0 : i32
    return %c0_i32, %c0_i32_0 : i32, i32
  }
  func.func @transform_4(%arg0: i32) -> (i32, i32) {
    %c0_i32 = arith.constant 0 : i32
    %c0_i32_0 = arith.constant 0 : i32
    return %c0_i32, %arg0 : i32, i32
  }
}

</mosaic_0001>

<bundles_post_ra>
// kernel: arcface_forward.1
= control target key start
LH: loop header
LB: loop body
LE: loop exit
PB: predicated region body
PF: predicated region fallthrough
CT: control target
= control target key end

     0   :  { %9 = vsyncpa [#allocation3], 0  ;;  %s690_s0 = inlined_call_operand.vmem [shape: f32[8,512], index: 0, kind: input, shape index: {}]   ;;  %s691_s1 = inlined_call_operand.vmem [shape: f32[8,8], index: 1, kind: input, shape index: {}]   ;;  %s692_s2 = inlined_call_operand.vmem [shape: f32[8,1], index: 2, kind: input, shape index: {}]   ;;  %s693_s3 = inlined_call_operand.vmem [shape: f32[8,1], index: 3, kind: input, shape index: {}]   ;;  %s694_s4 = inlined_call_operand.hbm [shape: f32[8,512], index: 4, kind: output, shape index: {}]  }
   0x1   :  { %11 = vsyncpa [#allocation3 + $0x1], 0  ;;  %s578_s15 = smov 0   ;;  %s580_s16 = smov 0  }
   0x2   :  { %s582_s17 = smov 0   ;;  %s584_s18 = smov 0  }
   0x3 LB: > { %s599_s19 = sadd.s32 4294967295, %s548_s18   ;;  %s425_s20 = sadd.s32 4294967294, %s548_s18   ;;  %s548_s18 = sphi %s584_s18, %s700_s18   ;;  %s544_s17 = sphi %s582_s17, %s699_s17   ;;  %s540_s16 = sphi %s580_s16, %s698_s16   ;;  %s536_s15 = sphi %s578_s15, %s697_s15  }
   0x4   : > { %s603_s21 = sadd.s32 1, %s548_s18   ;;  %s113_s22 = sadd.s32 1, %s544_s17 }
   0x5   : > { %s110_s23 = ssub.s32 %s548_s18, %s603_s21  ;;  %p123_p0 = scmp.ne.s32.totalorder %s544_s17, %s540_s16 }
   0x6   : > { %p111_p1 = scmp.eq.s32.totalorder %s110_s23, 0  ;;  %p124_p2 = scmp.eq.s32.totalorder %s599_s19, 1 }
   0x7   : > { %p129_p3 = scmp.ne.s32.totalorder %s540_s16, %s536_s15  ;;  %p130_p4 = scmp.eq.s32.totalorder %s425_s20, 1 }
   0x8   : > { %s614_s24 = scalar_select %p111_p1, %s544_s17, %s113_s22  }
   0x9   : > { %p616_p5 = por %p124_p2, %p123_p0  ;;  %p620_p6 = por %p130_p4, %p129_p3 }
   0xa   : > { %p428_p7 = scmp.ge.s32.totalorder %s548_s18, 1  ;;  %p166_p8 = scmp.lt.s32.totalorder %s548_s18, 3 }
   0xc   : > { %p167_p9 = pnand %p428_p7, %p166_p8 }
   0xd   : > { %v199_v0 = vld [vmem:[%s691_s1] sm:$0xff] (!%p167_p9)  ;;  %s430_s29 = sshll.u32 (!%p167_p9), %s599_s19, 1  ;;  %v550_v1 = vmov (!%p167_p9), 0.0   ;;  %v551_v3 = vmov (!%p167_p9), 0   ;;  %vm234_vm0 = vcmask (!%p167_p9), 64512   ;;  %s189_s12 = sand.u32 (!%p167_p9), 1, %s540_s16  }
   0xe   : > { %170 = sbr.rel (%p167_p9) target bundleno = 396 (0x18c), region = 36  ;;  %202 = vxpose.xlu0.b32.start.end [1/1] (short) (narrow) (!%p167_p9), %v199_v0, 8  ;;  %p193_p10 = scmp.lt.s32.totalorder (!%p167_p9), %s430_s29, 3  ;;  %302 = vmatprep.mubr.f32.mxu0 (!%p167_p9), %v550_v1  ;;  %v341_v2 = vld [vmem:[%s693_s3] sm:$0xff] (!%p167_p9) }
   0xf   : > { %481 = vset.pattern.permute.xlu1 (!%p167_p9), %v551_v3  ;;  %v331_v6 = vld [vmem:[%s692_s2] sm:$0xff] (!%p167_p9)  ;;  %s429_s13 = sshll.u32 (!%p167_p9), %s189_s12, 4  ;;  %s438_s14 = sshll.u32 (!%p167_p9), %s599_s19, 8 }
  0x10   : > { %344 = vperm.xlu1 (!%p167_p9), %481, %v341_v2   ;;  %s191_s20 = scalar_lea.vmem (!%p167_p9), [#allocation2], %s429_s13  ;;  %s646_s28 = scalar_lea.hbm (!%p167_p9), %s694_s4, %s438_s14 }
  0x11   : > { %s366_s22 = sshll.u32 (!%p167_p9), %s191_s20, 4  ;;  %s352_s19 = scalar_lea.sflag (!%p167_p9), [#allocation3], %s189_s12  ;;  %s648_s22 = int_to_ptr.vmem [resolvable:$true] %s366_s22 }
  0x12   : > { %s552_s30 = smov (!%p167_p9), [#allocation2]  }
  0x13   : > { %s490_s5 = sshll.u32 (!%p167_p9), %s552_s30, 4  ;;  %s491_s5 = int_to_ptr.vmem [resolvable:$false] %s490_s5 }
  0x14   : > { %p493_p0 = scmp.lt.s32.totalorder (!%p167_p9), %s648_s22, %s491_s5 }
  0x15   : > { %s702_s29 = smov (!%p193_p10, %s430_s29), 3 }
  0x16   : > { %s431_s6 = sshll.u32 %s702_s29, 3  ;;  %s486_s29 = scalar_lea.vmem %s648_s22, 256 }
  0x17   : > { %s196_s9 = scalar_lea.vmem %s690_s0, %s431_s6  ;;  %p487_p11 = scmp.ne.s32.totalorder %s648_s22, %s486_s29 }
  0x18   : > { %v201_v4 = vld [vmem:[%s196_s9 + $0x8] sm:$0xff]  ;;  %v200_v5 = vld [vmem:[%s196_s9] sm:$0xff]  ;;  %s492_s6 = scalar_lea.vmem %s491_s5, 512 }
  0x19   : > { %238 = vmatprep.subr.mxu0 %v201_v4  ;;  %p488_p12 = pnand %p487_p11, %p616_p5  ;;  %p494_p1 = scmp.lt.s32.totalorder %s492_s6, %s486_s29 }
  0x1a   : > { %239 = vmatpush1.msra.mxu0 %v200_v5 }
  0x1b   : > { %p489_p13 = pneg %p488_p12  ;;  %p495_p2 = por %p494_p1, %p493_p0 }
  0x1d   : > { %p496_p3 = pnand %p495_p2, %p489_p13 }
  0x37   : > { %480 = vset.pattern.permute.xlu0 %v551_v3 }
  0x38   : > { %336 = vperm.xlu0 %480, %v331_v6  }
  0x8e   : > { %v218_v7 = vpop.trf.xlu0 }
  0x8f   : > { %432 = vmatmul.mubr.msk.f32.vlgmr.msra.gmra.mrb[0].mxu0 %vm234_vm0, %v218_v7  ;;  %v345_v29 = vpop.permute.xlu1 %344 }
  0xb7   : > { %v337_v23 = vpop.permute.xlu0 %336 }
 0x162   : > { %v304_v8 = vpop.f32.mrb[0].mxu0 }
 0x163   : > { %v309_v9 = vmul.f32 %v304_v8, %v304_v8  ;;  %v306_v10 = vpop.f32.mrb[1].mxu0  ;;  %vm329_vm5 = vcmp.gt.f32.partialorder %v304_v8, 0.0 }
 0x164   : > { %v310_v11 = vmul.f32 %v306_v10, %v306_v10  ;;  %vm330_vm6 = vcmp.gt.f32.partialorder %v306_v10, 0.0 }
 0x165   : > { %v311_v12 = vsub.f32 1.0, %v309_v9 }
 0x166   : > { %v312_v13 = vsub.f32 1.0, %v310_v11 }
 0x167   : > { %v313_v14 = vmax.f32 %v311_v12, 0.0 }
 0x168   : > { %v314_v15 = vmax.f32 %v312_v13, 0.0 }
 0x169   : > { %482 = vrsqrt.f32 %v313_v14  ;;  %vm317_vm1 = vcmp.eq.f32.partialorder %v313_v14, inf  ;;  %v320_v19 = vand.u32 2147483648, %v313_v14  ;;  %vm319_vm2 = vcmp.eq.f32.partialorder %v313_v14, 0.0 }
 0x16a   : > { %484 = vrsqrt.f32 %v314_v15  ;;  %vm324_vm3 = vcmp.eq.f32.partialorder %v314_v15, inf  ;;  %v327_v22 = vand.u32 2147483648, %v314_v15  ;;  %vm326_vm4 = vcmp.eq.f32.partialorder %v314_v15, 0.0 }
 0x173   : > { %v483_v16 = vpop.eup %482 }
 0x174   : > { %v485_v17 = vpop.eup %484  ;;  %v316_v18 = vmul.f32 %v483_v16, %v313_v14 }
 0x175   : > { %v323_v20 = vmul.f32 %v485_v17, %v314_v15 }
 0x176   : > { %v318_v21 = vsel %vm317_vm1, %v313_v14, %v316_v18 }
 0x177   : > { %v321_v24 = vsel %vm319_vm2, %v320_v19, %v318_v21  ;;  %v325_v25 = vsel %vm324_vm3, %v314_v15, %v323_v20 }
 0x178   : > { %v328_v26 = vsel %vm326_vm4, %v327_v22, %v325_v25  ;;  %v332_v27 = vmul.f32 30.683235, %v321_v24 }
 0x179   : > { %v333_v28 = vmul.f32 30.683235, %v328_v26 }
 0x17a   : > { %v339_v30 = vsub.f32 %v337_v23, %v332_v27 }
 0x17b   : > { %v340_v31 = vsub.f32 %v337_v23, %v333_v28 }
 0x17c   : > { %v347_v32 = vsel %vm329_vm5, %v339_v30, %v345_v29 }
 0x17d   : > { %v348_v33 = vsel %vm330_vm6, %v340_v31, %v345_v29  ;;  %349 = vst [vmem:[%s191_s20] sm:$0xff] %v347_v32 }
 0x17e   : > { %350 = vst [vmem:[%s191_s20 + $0x8] sm:$0xff] %v348_v33 }
 0x17f   : > { %499 = shalt.err (!%p496_p3)
}
 0x180   : > { %s500_s7 = scalar_lea.hbm %s646_s28, 256  ;;  %s504_s10 = scalar_lea.hbm %s694_s4, 512 }
 0x181   : > { %p501_p4 = scmp.ne.s32.totalorder %s646_s28, %s500_s7  ;;  %p505_p9 = scmp.lt.u32.totalorder %s646_s28, %s694_s4 }
 0x182   : > { %p506_p10 = scmp.lt.u32.totalorder %s504_s10, %s500_s7  ;;  %p508_p12 = scmp.lt.u32.totalorder %s500_s7, %s646_s28 }
 0x183   : > { %p502_p7 = pnand %p501_p4, %p616_p5 }
 0x184   : > { %p507_p11 = por %p506_p10, %p505_p9 }
 0x185   : > { %p503_p8 = pneg %p502_p7 }
 0x186   : > { %p509_p13 = por %p508_p12, %p507_p11 }
 0x188   : > { %p510_p0 = pnand %p509_p13, %p503_p8 }
 0x18a   : > { %513 = shalt.err (!%p510_p0)
}
 0x18b   : > { %439 = dma.vmem_to_hbm [thread:$0]  (%p616_p5), %s648_s22, 256, %s646_s28, %s352_s19  }
 0x18c PF: > { %p445_p1 = scmp.ge.s32.totalorder %s548_s18, 2  ;;  %s378_s13 = sand.u32 1, %s536_s15  }
 0x18d   : > { %s379_s14 = scalar_lea.sflag [#allocation3], %s378_s13 }
 0x18e   : > { %p442_p2 = pnand %p445_p1, %p620_p6 }
 0x190   : > { %531 = dma.done.wait (!%p442_p2), %s379_s14, 256  }
 0x191   : > { %533 = vsyncadd (!%p442_p2), %s379_s14, 4294967040  ;;  %p14_p3 = scmp.ge.s32.totalorder %s603_s21, 4   ;;  %s697_s15 = smov %s540_s16 }
 0x192   : > { %s698_s16 = smov %s544_s17  ;;  %s699_s17 = smov %s614_s24 }
 0x193   : > { %s700_s18 = smov %s603_s21  ;;  %16 = sbr.rel (!%p14_p3) target bundleno = 3 (0x3), region = 71 }
 0x19a   :  { %384 = vsyncpa [#allocation3], 1 }
 0x19b   :  { %386 = vsyncpa [#allocation3 + $0x1], 1 }

</bundles_post_ra>
